<compile_context>
chip_gen: v7x
topology: tpu7x:2x2x1
jax: 0.10.0
libtpu: 0.0.40
codegen_flags: <defaults>
</compile_context>

<pallas_src>
import functools

import jax
import jax.numpy as jnp
from jax.experimental import pallas as pl
from jax.experimental.pallas import tpu as pltpu


# ----------------------------- kernels ------------------------------------ #

def _lora_plain_kernel(x_ref, at_ref, bt_ref, out_ref, acc_ref, *, scaling):
    # Grid: (token tiles, K tiles).  x_ref: (tm, tk)  at_ref: (tk, r)  bt_ref: (r, out)
    k = pl.program_id(1)

    @pl.when(k == 0)
    def _():
        acc_ref[...] = jnp.zeros_like(acc_ref)

    acc_ref[...] += jnp.dot(x_ref[...], at_ref[...],
                            preferred_element_type=jnp.float32)

    @pl.when(k == pl.num_programs(1) - 1)
    def _():
        xa = acc_ref[...] * scaling                      # scale the tiny (tm, r) tile
        out_ref[...] = jnp.dot(xa.astype(bt_ref.dtype), bt_ref[...],
                               preferred_element_type=jnp.float32).astype(out_ref.dtype)


def _lora_res_kernel(x_ref, at_ref, bt_ref, prexa_ref, out_ref, xa_ref, acc_ref, *,
                     scaling):
    # res_flag == 1 with pre_xa: also emits cur_xa, adds pre_xa before the B projection.
    k = pl.program_id(1)

    @pl.when(k == 0)
    def _():
        acc_ref[...] = jnp.zeros_like(acc_ref)

    acc_ref[...] += jnp.dot(x_ref[...], at_ref[...],
                            preferred_element_type=jnp.float32)

    @pl.when(k == pl.num_programs(1) - 1)
    def _():
        cur_xa = acc_ref[...]
        xa_ref[...] = cur_xa.astype(xa_ref.dtype)
        summed = (cur_xa + prexa_ref[...].astype(jnp.float32)) * scaling
        out_ref[...] = jnp.dot(summed.astype(bt_ref.dtype), bt_ref[...],
                               preferred_element_type=jnp.float32).astype(out_ref.dtype)


def _lora_res_noprexa_kernel(x_ref, at_ref, bt_ref, out_ref, xa_ref, acc_ref, *, scaling):
    # res_flag == 1, pre_xa is None: emit cur_xa, skip the add (no zeros HBM stream).
    k = pl.program_id(1)

    @pl.when(k == 0)
    def _():
        acc_ref[...] = jnp.zeros_like(acc_ref)

    acc_ref[...] += jnp.dot(x_ref[...], at_ref[...],
                            preferred_element_type=jnp.float32)

    @pl.when(k == pl.num_programs(1) - 1)
    def _():
        cur_xa = acc_ref[...]
        xa_ref[...] = cur_xa.astype(xa_ref.dtype)
        out_ref[...] = jnp.dot((cur_xa * scaling).astype(bt_ref.dtype), bt_ref[...],
                               preferred_element_type=jnp.float32).astype(out_ref.dtype)


# --------------------------- tiling helpers -------------------------------- #

def _round_up(x, mult):
    return ((x + mult - 1) // mult) * mult


_SUBLANE_MULT = {1: 32, 2: 16, 4: 8}   # itemsize -> sublane packing multiple


def _padded_block_bytes(rows, cols, dtype):
    """Physical VMEM footprint of a (rows, cols) block: lanes pad to 128, sublanes to 8/16/32."""
    itemsize = jnp.dtype(dtype).itemsize
    sub = _SUBLANE_MULT.get(itemsize, 8)
    return _round_up(max(rows, 1), sub) * _round_up(max(cols, 1), 128) * itemsize


def _vmem_config():
    """Return (tile_budget_bytes, vmem_limit_bytes), generation-aware, per TensorCore."""
    try:
        cap = int(pltpu.get_tpu_info().vmem_capacity_bytes)
    except Exception:
        cap = 64 << 20                      # conservative (v7x-sized) fallback
    if cap >= (100 << 20):                  # v5e / v6e: 128 MiB per TC
        return 80 << 20, 100 << 20
    return 28 << 20, 40 << 20               # v7x: 64 MiB per TC; leave Mosaic scratch headroom


def _choose_tk(in_feature):
    """Contraction tile: full in_feature when small, else the largest 128-multiple divisor."""
    if in_feature <= 2048:
        return in_feature
    for cand in (2048, 1024, 512, 256, 128):
        if in_feature % cand == 0:
            return cand
    # TODO(synk): ragged K would need in-kernel masking (boundary reads are not zeroed);
    # fall back to a single full-width K block in that (rare) case.
    return in_feature


def _choose_tm(m, tk, out_feature, r, x_dtype, w_dtype, prexa_dtype, res_flag,
               has_prexa, budget):
    """Largest token tile (multiple of 16, <=1024) whose double-buffered streams fit VMEM."""
    # Weight blocks are constant across the grid but conservatively counted double-buffered.
    resident = 2 * (_padded_block_bytes(tk, r, w_dtype)
                    + _padded_block_bytes(r, out_feature, w_dtype))
    tm = 16
    for cand in (1024, 512, 256, 128, 64, 32, 16):
        per_tile = 2 * (_padded_block_bytes(cand, tk, x_dtype)
                        + _padded_block_bytes(cand, out_feature, x_dtype))
        if res_flag:
            per_tile += 2 * _padded_block_bytes(cand, r, x_dtype)        # cur_xa stream
            if has_prexa:
                per_tile += 2 * _padded_block_bytes(cand, r, prexa_dtype)
        per_tile += _padded_block_bytes(cand, r, jnp.float32)            # accumulator scratch
        if resident + per_tile <= budget:
            tm = cand
            break
    # Never larger than the (16-aligned) problem ...
    tm = min(tm, _round_up(m, 16))
    # ... and keep >=2 grid_m steps when possible (megacore sharding + pipeline overlap).
    if m > 16:
        tm = min(tm, max(16, _round_up((m + 1) // 2, 16)))
    return max(16, tm)


# ----------------------------- wrappers ------------------------------------ #

def prepare_lora_weights(lora_A, lora_B):
    """Transpose the LoRA weights ONCE at load time (A -> (in, r), B -> (r, out)) so each
    forward call pays no extra XLA transpose / HBM round trip over the weights."""
    return jnp.transpose(lora_A), jnp.transpose(lora_B)


def lora_block_forward(x, a_t, b_t, lora_alpha, rank, res_flag=0, pre_xa=None):
    """JAX/Pallas equivalent of LoraBlock.forward (lora_dropout disabled / eval mode).

    a_t, b_t are the pre-transposed weights from prepare_lora_weights().
    Returns out (res_flag == 0) or (out, cur_xa) (res_flag == 1).
    """
    assert rank > 0, "r == 0 path (module returns scalar 0) has no kernel"
    scaling = float(lora_alpha) / float(rank)

    in_feature, r = a_t.shape
    rb, out_feature = b_t.shape
    assert r == rank and rb == rank

    orig_lead = x.shape[:-1]
    x2d = x.reshape(-1, in_feature)          # glue: flatten leading dims
    m = x2d.shape[0]

    tile_budget, vmem_limit = _vmem_config()
    tk = _choose_tk(in_feature)
    has_prexa = pre_xa is not None
    prexa_dtype = pre_xa.dtype if has_prexa else x.dtype
    tm = _choose_tm(m, tk, out_feature, r, x.dtype, a_t.dtype, prexa_dtype,
                    res_flag, has_prexa, tile_budget)

    # No jnp.pad / slicing: Pallas pads boundary-block reads and masks boundary stores.
    grid = (pl.cdiv(m, tm), pl.cdiv(in_feature, tk))

    x_spec = pl.BlockSpec((tm, tk), lambda i, k: (i, k))
    at_spec = pl.BlockSpec((tk, r), lambda i, k: (k, 0))
    bt_spec = pl.BlockSpec((r, out_feature), lambda i, k: (0, 0))
    out_spec = pl.BlockSpec((tm, out_feature), lambda i, k: (i, 0))
    xa_spec = pl.BlockSpec((tm, r), lambda i, k: (i, 0))
    scratch = [pltpu.VMEM((tm, r), jnp.float32)]

    cparams = pltpu.CompilerParams(
        dimension_semantics=("parallel", "arbitrary"),   # token axis shards across v7x's 2 TCs
        vmem_limit_bytes=vmem_limit)

    if not res_flag:
        out2d = pl.pallas_call(
            functools.partial(_lora_plain_kernel, scaling=scaling),
            out_shape=jax.ShapeDtypeStruct((m, out_feature), x.dtype),
            grid_spec=pltpu.PrefetchScalarGridSpec(
                num_scalar_prefetch=0, grid=grid,
                in_specs=[x_spec, at_spec, bt_spec],
                out_specs=out_spec,
                scratch_shapes=scratch),
            compiler_params=cparams,
        )(x2d, a_t, b_t)
        return out2d.reshape(*orig_lead, out_feature)

    # ------------------------- res_flag == 1 paths ------------------------ #
    out_shapes = (jax.ShapeDtypeStruct((m, out_feature), x.dtype),
                  jax.ShapeDtypeStruct((m, r), x.dtype))
    if pre_xa is None:
        out2d, xa2d = pl.pallas_call(
            functools.partial(_lora_res_noprexa_kernel, scaling=scaling),
            out_shape=out_shapes,
            grid_spec=pltpu.PrefetchScalarGridSpec(
                num_scalar_prefetch=0, grid=grid,
                in_specs=[x_spec, at_spec, bt_spec],
                out_specs=[out_spec, xa_spec],
                scratch_shapes=scratch),
            compiler_params=cparams,
        )(x2d, a_t, b_t)
    else:
        pre_xa2d = pre_xa.reshape(-1, r)
        out2d, xa2d = pl.pallas_call(
            functools.partial(_lora_res_kernel, scaling=scaling),
            out_shape=out_shapes,
            grid_spec=pltpu.PrefetchScalarGridSpec(
                num_scalar_prefetch=0, grid=grid,
                in_specs=[x_spec, at_spec, bt_spec, xa_spec],
                out_specs=[out_spec, xa_spec],
                scratch_shapes=scratch),
            compiler_params=cparams,
        )(x2d, a_t, b_t, pre_xa2d)

    return (out2d.reshape(*orig_lead, out_feature),
            xa2d.reshape(*orig_lead, r))


# ------------------------------- main -------------------------------------- #

if __name__ == "__main__":
    # ResLoraConfig-style hyperparameters
    rank = 8
    lora_alpha = 16          # scaling = 2.0
    in_feature = 32
    out_feature = 32
    batch, seq = 2, 8

    key = jax.random.PRNGKey(0)
    kx, ka, kb, kp = jax.random.split(key, 4)

    # Deterministic parameter init (module creates zeros; use random values so the
    # computation is non-trivial — this is a synthetic kernel, not a checkpoint load).
    x = jax.random.normal(kx, (batch, seq, in_feature), dtype=jnp.float32)
    lora_A = jax.random.normal(ka, (rank, in_feature), dtype=jnp.float32) * 0.1
    lora_B = jax.random.normal(kb, (out_feature, rank), dtype=jnp.float32) * 0.1
    pre_xa = jax.random.normal(kp, (batch, seq, rank), dtype=jnp.float32) * 0.1

    scaling = lora_alpha / rank
    a_t, b_t = prepare_lora_weights(lora_A, lora_B)   # transpose once, not per call

    # res_flag = 0 path
    out0 = lora_block_forward(x, a_t, b_t, lora_alpha, rank, res_flag=0)
    out0 = jax.block_until_ready(out0)
    ref0 = (x @ lora_A.T @ lora_B.T) * scaling
    assert jnp.allclose(out0, ref0, atol=1e-4, rtol=1e-4)

    # res_flag = 1 path, with pre_xa
    out1, cur_xa = lora_block_forward(x, a_t, b_t, lora_alpha, rank,
                                      res_flag=1, pre_xa=pre_xa)
    out1 = jax.block_until_ready(out1)
    cur_xa = jax.block_until_ready(cur_xa)
    ref_xa = x @ lora_A.T
    ref1 = ((ref_xa + pre_xa) @ lora_B.T) * scaling
    assert jnp.allclose(cur_xa, ref_xa, atol=1e-4, rtol=1e-4)
    assert jnp.allclose(out1, ref1, atol=1e-4, rtol=1e-4)

    # res_flag = 1 path, pre_xa is None
    out2, _ = lora_block_forward(x, a_t, b_t, lora_alpha, rank,
                                 res_flag=1, pre_xa=None)
    out2 = jax.block_until_ready(out2)
    ref2 = (ref_xa @ lora_B.T) * scaling
    assert jnp.allclose(out2, ref2, atol=1e-4, rtol=1e-4)

    # Non-divisible token count exercises the ragged (cdiv-grid, masked-store) path
    # without any jnp.pad / slice extra HBM passes (batch*seq = 2*7 = 14 tokens).
    x_odd = jax.random.normal(kx, (2, 7, in_feature), dtype=jnp.float32)
    out3 = lora_block_forward(x_odd, a_t, b_t, lora_alpha, rank, res_flag=0)
    out3 = jax.block_until_ready(out3)
    ref3 = (x_odd @ lora_A.T @ lora_B.T) * scaling
    assert jnp.allclose(out3, ref3, atol=1e-4, rtol=1e-4)

    print("KERNEL_OK")
</pallas_src>

<mosaic_0001>
module attributes {stable_mosaic.version = 11 : i64} {
  func.func @_lora_plain_kernel(%arg0: i32, %arg1: i32, %arg2: memref<16x32xf32, #tpu.memory_space<vmem>>, %arg3: memref<32x8xf32, #tpu.memory_space<vmem>>, %arg4: memref<8x32xf32, #tpu.memory_space<vmem>>, %arg5: memref<16x32xf32, #tpu.memory_space<vmem>>, %arg6: memref<16x8xf32, #tpu.memory_space<vmem>>) attributes {dimension_semantics = [#tpu.dimension_semantics<parallel>, #tpu.dimension_semantics<arbitrary>], iteration_bounds = array<i64: 1, 1>, scalar_prefetch = 0 : i64, scratch_operands = 1 : i64, tpu.core_type = #tpu.core_type<tc>, window_params = [{transform_indices = @transform_0, window_bounds = array<i64: 16, 32>}, {transform_indices = @transform_1, window_bounds = array<i64: 32, 8>}, {pipeline_mode = #tpu.pipeline_mode<synchronous>, transform_indices = @transform_2, window_bounds = array<i64: 8, 32>}, {transform_indices = @transform_3, window_bounds = array<i64: 16, 32>}]} {
    %c0_i32 = arith.constant 0 : i32
    %0 = arith.cmpi eq, %arg1, %c0_i32 : i32
    %1 = arith.extui %0 : i1 to i32
    %c0_i32_0 = arith.constant 0 : i32
    %2 = arith.cmpi ne, %1, %c0_i32_0 : i32
    scf.if %2 {
      %cst_10 = arith.constant 0.000000e+00 : f32
      %12 = vector.broadcast %cst_10 : f32 to vector<16x8xf32>
      %c0_11 = arith.constant 0 : index
      %c0_12 = arith.constant 0 : index
      %13 = vector.load %arg6[%c0_11, %c0_12] : memref<16x8xf32, #tpu.memory_space<vmem>>, vector<16x8xf32>
      tpu.vector_store %arg6[%c0_11, %c0_12], %12 {strides = array<i32>} : memref<16x8xf32, #tpu.memory_space<vmem>>, vector<16x8xf32>,
    } else {
    }
    %c0 = arith.constant 0 : index
    %c0_1 = arith.constant 0 : index
    %3 = vector.load %arg6[%c0, %c0_1] : memref<16x8xf32, #tpu.memory_space<vmem>>, vector<16x8xf32>
    %c0_2 = arith.constant 0 : index
    %c0_3 = arith.constant 0 : index
    %4 = vector.load %arg2[%c0_2, %c0_3] : memref<16x32xf32, #tpu.memory_space<vmem>>, vector<16x32xf32>
    %c0_4 = arith.constant 0 : index
    %c0_5 = arith.constant 0 : index
    %5 = vector.load %arg3[%c0_4, %c0_5] : memref<32x8xf32, #tpu.memory_space<vmem>>, vector<32x8xf32>
    %cst = arith.constant dense<0.000000e+00> : vector<16x8xf32>
    %6 = tpu.matmul %4, %5, %cst {dimension_numbers = #tpu.dot_dimension_numbers<[1], [0], [0], [1], [0, 0, 1, 1], [], []>} : vector<16x32xf32>, vector<32x8xf32>, vector<16x8xf32> -> vector<16x8xf32>
    %7 = arith.addf %3, %6 : vector<16x8xf32>
    %c0_6 = arith.constant 0 : index
    %c0_7 = arith.constant 0 : index
    %8 = vector.load %arg6[%c0_6, %c0_7] : memref<16x8xf32, #tpu.memory_space<vmem>>, vector<16x8xf32>
    tpu.vector_store %arg6[%c0_6, %c0_7], %7 {strides = array<i32>} : memref<16x8xf32, #tpu.memory_space<vmem>>, vector<16x8xf32>,
    %c0_i32_8 = arith.constant 0 : i32
    %9 = arith.cmpi eq, %arg1, %c0_i32_8 : i32
    %10 = arith.extui %9 : i1 to i32
    %c0_i32_9 = arith.constant 0 : i32
    %11 = arith.cmpi ne, %10, %c0_i32_9 : i32
    scf.if %11 {
      %c0_10 = arith.constant 0 : index
      %c0_11 = arith.constant 0 : index
      %12 = vector.load %arg6[%c0_10, %c0_11] : memref<16x8xf32, #tpu.memory_space<vmem>>, vector<16x8xf32>
      %cst_12 = arith.constant 2.000000e+00 : f32
      %13 = vector.broadcast %cst_12 : f32 to vector<16x8xf32>
      %14 = arith.mulf %12, %13 : vector<16x8xf32>
      %c0_13 = arith.constant 0 : index
      %c0_14 = arith.constant 0 : index
      %15 = vector.load %arg4[%c0_13, %c0_14] : memref<8x32xf32, #tpu.memory_space<vmem>>, vector<8x32xf32>
      %cst_15 = arith.constant dense<0.000000e+00> : vector<16x32xf32>
      %16 = tpu.matmul %14, %15, %cst_15 {dimension_numbers = #tpu.dot_dimension_numbers<[1], [0], [0], [1], [0, 0, 1, 1], [], []>} : vector<16x8xf32>, vector<8x32xf32>, vector<16x32xf32> -> vector<16x32xf32>
      %c0_16 = arith.constant 0 : index
      %c0_17 = arith.constant 0 : index
      %17 = vector.load %arg5[%c0_16, %c0_17] : memref<16x32xf32, #tpu.memory_space<vmem>>, vector<16x32xf32>
      tpu.vector_store %arg5[%c0_16, %c0_17], %16 {strides = array<i32>} : memref<16x32xf32, #tpu.memory_space<vmem>>, vector<16x32xf32>,
    } else {
    }
    return
  }
  func.func @transform_0(%arg0: i32, %arg1: i32) -> (i32, i32) {
    %c0_i32 = arith.constant 0 : i32
    return %arg0, %arg1 : i32, i32
  }
  func.func @transform_1(%arg0: i32, %arg1: i32) -> (i32, i32) {
    %c0_i32 = arith.constant 0 : i32
    %c0_i32_0 = arith.constant 0 : i32
    return %arg1, %c0_i32 : i32, i32
  }
  func.func @transform_2(%arg0: i32, %arg1: i32) -> (i32, i32) {
    %c0_i32 = arith.constant 0 : i32
    %c0_i32_0 = arith.constant 0 : i32
    %c0_i32_1 = arith.constant 0 : i32
    return %c0_i32, %c0_i32_0 : i32, i32
  }
  func.func @transform_3(%arg0: i32, %arg1: i32) -> (i32, i32) {
    %c0_i32 = arith.constant 0 : i32
    %c0_i32_0 = arith.constant 0 : i32
    return %arg0, %c0_i32 : i32, i32
  }
}

</mosaic_0001>

<bundles_post_ra>
// kernel: tpu_custom_call.1
= control target key start
LH: loop header
LB: loop body
LE: loop exit
PB: predicated region body
PF: predicated region fallthrough
CT: control target
= control target key end

     0   :  { %vm30_vm0 = vcmask 261120   ;;  %vm19_vm1 = vcmask 64512   ;;  %v289_v6 = vmov 0.0   ;;  %s356_s0 = inlined_call_operand.vmem [shape: f32[16,32], index: 0, kind: input, shape index: {}]   ;;  %s357_s1 = inlined_call_operand.vmem [shape: f32[32,8], index: 1, kind: input, shape index: {}]   ;;  %s358_s2 = inlined_call_operand.vmem [shape: f32[8,32], index: 2, kind: input, shape index: {}]   ;;  %s359_s3 = inlined_call_operand.hbm [shape: f32[16,32], index: 3, kind: output, shape index: {}]  }
   0x1   :  { %v26_v0 = vld [vmem:[%s357_s1] sm:$0xff]  ;;  %v27_v1 = vld [vmem:[%s357_s1 + $0x8] sm:$0xff]  ;;  %v28_v2 = vld [vmem:[%s357_s1 + $0x10] sm:$0xff]  ;;  %21 = vst.msk [vmem:[#allocation2 + $0x8] sm:$0xff] %vm19_vm1, %v289_v6 }
   0x2   :  { %v253_v3 = vpack.c.bf16 %v27_v1, %v26_v0  ;;  %v29_v4 = vld [vmem:[%s357_s1 + $0x18] sm:$0xff]  ;;  %v24_v5 = vld [vmem:[%s356_s0] sm:$0xff]  ;;  %20 = vst.msk [vmem:[#allocation2] sm:$0xff] %vm19_vm1, %v289_v6 }
   0x3   :  { %v257_v7 = vpack.c.bf16 %v29_v4, %v28_v2  ;;  %245 = vmatprep.mubr.msk.f32.mxu0 %vm30_vm0, %v24_v5 }
   0x4   :  { %8 = vsyncpa [#allocation4], 0  ;;  %254 = vmatprep.subr.bf16.mxu0 %v253_v3  ;;  %v25_v8 = vld [vmem:[%s356_s0 + $0x8] sm:$0xff]  ;;  %v124_v9 = vld [vmem:[%s358_s2] sm:$0xff]  ;;  %s290_s0 = smov [#allocation3]  }
   0x5   :  { %256 = vmatpush3.bf16.msra.mxu0 %v253_v3  ;;  %248 = vmatprep.subr.mxu1 %v124_v9  ;;  %s213_s2 = sshll.u32 %s290_s0, 4  ;;  %s214_s2 = int_to_ptr.vmem [resolvable:$true] %s213_s2 }
   0x6   :  { %258 = vmatprep.subr.bf16.mxu0 %v257_v7  ;;  %249 = vmatpush3.msra.mxu1 %v124_v9  ;;  %s265_s25 = scalar_lea.vmem %s214_s2, 256  ;;  %p270_p1 = scmp.lt.s32.totalorder %s214_s2, %s214_s2 }
   0x7   :  { %p266_p0 = scmp.ne.s32.totalorder %s214_s2, %s265_s25  ;;  %p271_p2 = scmp.lt.s32.totalorder %s265_s25, %s265_s25 }
   0x8   :  { %v23_v10 = vld [vmem:[#allocation2 + $0x8] sm:$0xff] }
   0x9   :  { %260 = vmatpush3.bf16.msra.mxu0 %v257_v7  ;;  %v22_v11 = vld [vmem:[#allocation2] sm:$0xff]  ;;  %p272_p3 = por %p271_p2, %p270_p1 }
   0xb   :  { %p273_p4 = pnand %p272_p3, %p266_p0 }
   0xc   :  { %246 = vmatmul.mubr.msk.f32.vlgmr.msra.gmra.mrb[0].mxu0 %vm30_vm0, %v25_v8 }
  0xdf   :  { %v247_v12 = vpop.f32.mrb[0].mxu0 }
  0xe0   :  { %v113_v13 = vadd.f32 %v247_v12, %v23_v10  ;;  %v103_v14 = vpop.f32.mrb[1].mxu0 }
  0xe1   :  { %v112_v15 = vadd.f32 %v103_v14, %v22_v11 }
  0xe2   :  { %116 = vst.msk [vmem:[#allocation2 + $0x8] sm:$0xff] %vm19_vm1, %v113_v13 }
  0xe3   :  { %115 = vst.msk [vmem:[#allocation2] sm:$0xff] %vm19_vm1, %v112_v15 }
  0xe9   :  { %v121_v16 = vld [vmem:[#allocation2 + $0x8] sm:$0xff] }
  0xea   :  { %v120_v17 = vld [vmem:[#allocation2] sm:$0xff]  ;;  %v123_v19 = vmul.f32 2.0, %v121_v16 }
  0xeb   :  { %v122_v18 = vmul.f32 2.0, %v120_v17 }
  0xed   :  { %250 = vmatprep.mubr.msk.f32.mxu1 %vm19_vm1, %v122_v18 }
  0xee   :  { %251 = vmatmul.mubr.msk.f32.vlgmr.msra.gmra.mrb[0].mxu1 %vm19_vm1, %v123_v19 }
 0x1c1   :  { %v252_v20 = vpop.f32.mrb[0].mxu1 }
 0x1c2   :  { %207 = vst.msk [vmem:[#allocation3 + $0x8] sm:$0xff] %vm30_vm0, %v252_v20  ;;  %v197_v21 = vpop.f32.mrb[1].mxu1 }
 0x1c3   :  { %206 = vst.msk [vmem:[#allocation3] sm:$0xff] %vm30_vm0, %v197_v21 }
 0x1c4   :  { %276 = shalt.err (!%p273_p4)
}
 0x1c5   :  { %s277_s28 = scalar_lea.hbm %s359_s3, 256 }
 0x1c6   :  { %p278_p5 = scmp.ne.s32.totalorder %s359_s3, %s277_s28  ;;  %p281_p6 = scmp.lt.u32.totalorder %s277_s28, %s359_s3 }
 0x1c8   :  { %p283_p7 = pnand %p281_p6, %p278_p5 }
 0x1ca   :  { %286 = shalt.err (!%p283_p7)
}
 0x1cb   :  { %s291_s6 = smov 128   ;;  %s292_s7 = smov 8  }
 0x1cc   :  { %219 = dma.vmem_to_hbm [thread:$0]  %s214_s2, 256, %s359_s3, [#allocation4], %s291_s6, %s291_s6, %s292_s7  }
 0x1cd   :  { %287 = dma.done.wait [#allocation4], 256  }
 0x1ce   :  { %288 = vsyncadd [#allocation4], 4294967040 }
 0x1cf   :  { %223 = vsyncpa [#allocation4], 1 }

</bundles_post_ra>
